<compile_context>
chip_gen: v7x
topology: tpu7x:2x2x1
jax: 0.10.0
libtpu: 0.0.40
codegen_flags: <defaults>
</compile_context>

<pallas_src>
import jax
import jax.numpy as jnp
from jax.experimental import pallas as pl
from jax.experimental.pallas import tpu as pltpu


def _round_up(x, m):
    return ((x + m - 1) // m) * m


def binclr_kernel(x_ref, w1_ref, b1_ref, w2_ref, b2_ref, w3_ref, b3_ref, o_ref):
    # x_ref: (eff_tile, 30), batch-major straight from HBM (ragged last block is
    # masked by Pallas; garbage rows only produce garbage output lanes that the
    # wrapper slices off).  One XLU transpose puts the batch on the lane axis.
    xT = x_ref[...].T                                               # (30, eff_tile)

    # Feature-major MLP on the MXU with f32 accumulation; ReLU on the VPU.
    h1 = jnp.dot(w1_ref[...], xT, preferred_element_type=jnp.float32) + b1_ref[...]
    h1 = jnp.maximum(h1, 0.0)                                       # (32, eff_tile)

    h2 = jnp.dot(w2_ref[...], h1, preferred_element_type=jnp.float32) + b2_ref[...]
    h2 = jnp.maximum(h2, 0.0)                                       # (16, eff_tile)

    out = jnp.dot(w3_ref[...], h2, preferred_element_type=jnp.float32) + b3_ref[...]
    o_ref[...] = out.astype(o_ref.dtype)                            # (1, eff_tile), lane-dense


def binclr_forward(x, w1, b1, w2, b2, w3, b3, *, tile_b=16384):
    """x: (B, 30), f32 or bf16 (fed to the MXU in its native dtype).

    Weights in PyTorch layout: w1 (32, 30), b1 (32,), w2 (16, 32), b2 (16,),
    w3 (1, 16), b3 (1,).  Returns (B, 1) float32.
    """
    B, f_in = x.shape
    assert f_in == 30

    # Tile selection:
    #   * target ~8 grid steps for large B (v7x has 2 TCs; "parallel" shards them),
    #   * floor of ~8192 rows per step (~1 MB of x DMA) so the ~0.35 us fixed
    #     per-grid-step cost stays hidden on all generations,
    #   * cap at tile_b so the lane-padded (eff_tile, 128) f32 input buffer
    #     (512 B/row, double-buffered) fits the 32 MiB VMEM limit below.
    eff_tile = min(
        tile_b,
        max(_round_up(pl.cdiv(B, 8), 128), min(8192, _round_up(B, 128))),
    )
    n_blocks = pl.cdiv(B, eff_tile)
    b_out = n_blocks * eff_tile          # output over-allocated to a block multiple (cheap)

    # Biases as (out, 1) columns so they broadcast along the lane (batch) axis.
    b1c = b1.reshape(-1, 1)
    b2c = b2.reshape(-1, 1)
    b3c = b3.reshape(-1, 1)

    # Constant index_map: parameters stay resident in VMEM across grid steps.
    const = lambda i: (0, 0)

    flops = 2 * B * (30 * 32 + 32 * 16 + 16 * 1)
    bytes_accessed = int(
        x.size * x.dtype.itemsize                                   # single read of x
        + B * 4                                                     # output write
        + sum(a.size * a.dtype.itemsize for a in (w1, b1, w2, b2, w3, b3))
    )

    out = pl.pallas_call(
        binclr_kernel,
        out_shape=jax.ShapeDtypeStruct((1, b_out), jnp.float32),
        grid_spec=pltpu.PrefetchScalarGridSpec(
            num_scalar_prefetch=0,
            grid=(n_blocks,),
            in_specs=[
                pl.BlockSpec((eff_tile, 30), lambda i: (i, 0)),     # batch-major x tile
                pl.BlockSpec((32, 30), const),                      # W1 (out, in)
                pl.BlockSpec((32, 1), const),                       # b1
                pl.BlockSpec((16, 32), const),                      # W2
                pl.BlockSpec((16, 1), const),                       # b2
                pl.BlockSpec((1, 16), const),                       # W3
                pl.BlockSpec((1, 1), const),                        # b3
            ],
            out_specs=pl.BlockSpec((1, eff_tile), lambda i: (0, i)),
        ),
        compiler_params=pltpu.CompilerParams(
            # "parallel" shards multi-step grids across v7x's 2 TensorCores;
            # measured no-op on single-TC v5e/v6e.
            dimension_semantics=("parallel",),
            # Explicit limit so the 16 MiB double-buffered x tile at the max
            # eff_tile also compiles on v5e (16 MiB default scoped VMEM);
            # 32 MiB is within the default/physical budget on v6e and v7x.
            vmem_limit_bytes=32 * 1024 * 1024,
        ),
        cost_estimate=pl.CostEstimate(
            flops=flops, transcendentals=0, bytes_accessed=bytes_accessed
        ),
    )(x, w1, b1c, w2, b2c, w3, b3c)

    return out[0, :B].reshape(B, 1)


def init_params(key):
    # PyTorch-style init and layout: W is (out_features, in_features), b is (out,).
    def linear_init(k, fan_in, fan_out):
        kw, kb = jax.random.split(k)
        bound = 1.0 / jnp.sqrt(float(fan_in))
        w = jax.random.uniform(kw, (fan_out, fan_in), jnp.float32, -bound, bound)
        b = jax.random.uniform(kb, (fan_out,), jnp.float32, -bound, bound)
        return w, b

    k1, k2, k3 = jax.random.split(key, 3)
    w1, b1 = linear_init(k1, 30, 32)
    w2, b2 = linear_init(k2, 32, 16)
    w3, b3 = linear_init(k3, 16, 1)
    return w1, b1, w2, b2, w3, b3


def reference_forward(x, w1, b1, w2, b2, w3, b3):
    h1 = jnp.maximum(x @ w1.T + b1, 0.0)
    h2 = jnp.maximum(h1 @ w2.T + b2, 0.0)
    return h2 @ w3.T + b3


if __name__ == "__main__":
    key = jax.random.PRNGKey(0)
    kx1, kx2, kx3, kp = jax.random.split(key, 4)

    params = init_params(kp)

    # Small batch (B=8): single ragged block (eff_tile=128), no wrapper pad.
    x_small = jax.random.normal(kx1, (8, 30), jnp.float32)
    out_small = jax.block_until_ready(binclr_forward(x_small, *params))
    ref_small = reference_forward(x_small, *params)
    assert out_small.shape == (8, 1)
    assert jnp.allclose(out_small, ref_small, atol=1e-5, rtol=1e-5), "small-batch mismatch"

    # Multi-step ragged grid (B=300, tile_b=128 -> grid=3, ragged last block):
    # exercises weight residency across steps and boundary masking on x reads.
    x_multi = jax.random.normal(kx2, (300, 30), jnp.float32)
    out_multi = jax.block_until_ready(binclr_forward(x_multi, *params, tile_b=128))
    ref_multi = reference_forward(x_multi, *params)
    assert out_multi.shape == (300, 1)
    assert jnp.allclose(out_multi, ref_multi, atol=1e-5, rtol=1e-5), "multi-tile mismatch"

    # Larger batch with the default tiling heuristic (B=5000 -> eff_tile=5120,
    # single ragged block): exercises the big-tile / in-kernel-transpose path.
    x_large = jax.random.normal(kx3, (5000, 30), jnp.float32)
    out_large = jax.block_until_ready(binclr_forward(x_large, *params))
    ref_large = reference_forward(x_large, *params)
    assert out_large.shape == (5000, 1)
    assert jnp.allclose(out_large, ref_large, atol=1e-5, rtol=1e-5), "large-batch mismatch"

    print("KERNEL_OK")
</pallas_src>

<mosaic_0001>
module attributes {stable_mosaic.version = 11 : i64} {
  func.func @binclr_kernel(%arg0: i32, %arg1: memref<128x30xf32, #tpu.memory_space<vmem>>, %arg2: memref<32x30xf32, #tpu.memory_space<vmem>>, %arg3: memref<32x1xf32, #tpu.memory_space<vmem>>, %arg4: memref<16x32xf32, #tpu.memory_space<vmem>>, %arg5: memref<16x1xf32, #tpu.memory_space<vmem>>, %arg6: memref<1x16xf32, #tpu.memory_space<vmem>>, %arg7: memref<1x1xf32, #tpu.memory_space<vmem>>, %arg8: memref<1x128xf32, #tpu.memory_space<vmem>>) attributes {dimension_semantics = [#tpu.dimension_semantics<parallel>], iteration_bounds = array<i64: 1>, scalar_prefetch = 0 : i64, scratch_operands = 0 : i64, tpu.core_type = #tpu.core_type<tc>, window_params = [{transform_indices = @transform_0, window_bounds = array<i64: 128, 30>}, {pipeline_mode = #tpu.pipeline_mode<synchronous>, transform_indices = @transform_1, window_bounds = array<i64: 32, 30>}, {pipeline_mode = #tpu.pipeline_mode<synchronous>, transform_indices = @transform_2, window_bounds = array<i64: 32, 1>}, {pipeline_mode = #tpu.pipeline_mode<synchronous>, transform_indices = @transform_3, window_bounds = array<i64: 16, 32>}, {pipeline_mode = #tpu.pipeline_mode<synchronous>, transform_indices = @transform_4, window_bounds = array<i64: 16, 1>}, {pipeline_mode = #tpu.pipeline_mode<synchronous>, transform_indices = @transform_5, window_bounds = array<i64: 1, 16>}, {pipeline_mode = #tpu.pipeline_mode<synchronous>, transform_indices = @transform_6, window_bounds = array<i64: 1, 1>}, {transform_indices = @transform_7, window_bounds = array<i64: 1, 128>}]} {
    %c0 = arith.constant 0 : index
    %c0_0 = arith.constant 0 : index
    %0 = vector.load %arg1[%c0, %c0_0] : memref<128x30xf32, #tpu.memory_space<vmem>>, vector<128x30xf32>
    %1 = tpu.transpose %0, [1, 0] : vector<128x30xf32> -> vector<30x128xf32>
    %c0_1 = arith.constant 0 : index
    %c0_2 = arith.constant 0 : index
    %2 = vector.load %arg2[%c0_1, %c0_2] : memref<32x30xf32, #tpu.memory_space<vmem>>, vector<32x30xf32>
    %cst = arith.constant dense<0.000000e+00> : vector<32x128xf32>
    %3 = tpu.matmul %2, %1, %cst {dimension_numbers = #tpu.dot_dimension_numbers<[1], [0], [0], [1], [0, 0, 1, 1], [], []>} : vector<32x30xf32>, vector<30x128xf32>, vector<32x128xf32> -> vector<32x128xf32>
    %c0_3 = arith.constant 0 : index
    %c0_4 = arith.constant 0 : index
    %4 = vector.load %arg3[%c0_3, %c0_4] : memref<32x1xf32, #tpu.memory_space<vmem>>, vector<32x1xf32>
    %5 = vector.broadcast %4 : vector<32x1xf32> to vector<32x128xf32>
    %6 = arith.addf %3, %5 : vector<32x128xf32>
    %cst_5 = arith.constant 0.000000e+00 : f32
    %7 = vector.broadcast %cst_5 : f32 to vector<32x128xf32>
    %8 = arith.maximumf %6, %7 : vector<32x128xf32>
    %c0_6 = arith.constant 0 : index
    %c0_7 = arith.constant 0 : index
    %9 = vector.load %arg4[%c0_6, %c0_7] : memref<16x32xf32, #tpu.memory_space<vmem>>, vector<16x32xf32>
    %cst_8 = arith.constant dense<0.000000e+00> : vector<16x128xf32>
    %10 = tpu.matmul %9, %8, %cst_8 {dimension_numbers = #tpu.dot_dimension_numbers<[1], [0], [0], [1], [0, 0, 1, 1], [], []>} : vector<16x32xf32>, vector<32x128xf32>, vector<16x128xf32> -> vector<16x128xf32>
    %c0_9 = arith.constant 0 : index
    %c0_10 = arith.constant 0 : index
    %11 = vector.load %arg5[%c0_9, %c0_10] : memref<16x1xf32, #tpu.memory_space<vmem>>, vector<16x1xf32>
    %12 = vector.broadcast %11 : vector<16x1xf32> to vector<16x128xf32>
    %13 = arith.addf %10, %12 : vector<16x128xf32>
    %cst_11 = arith.constant 0.000000e+00 : f32
    %14 = vector.broadcast %cst_11 : f32 to vector<16x128xf32>
    %15 = arith.maximumf %13, %14 : vector<16x128xf32>
    %c0_12 = arith.constant 0 : index
    %c0_13 = arith.constant 0 : index
    %16 = vector.load %arg6[%c0_12, %c0_13] : memref<1x16xf32, #tpu.memory_space<vmem>>, vector<1x16xf32>
    %cst_14 = arith.constant dense<0.000000e+00> : vector<1x128xf32>
    %17 = tpu.matmul %16, %15, %cst_14 {dimension_numbers = #tpu.dot_dimension_numbers<[1], [0], [0], [1], [0, 0, 1, 1], [], []>} : vector<1x16xf32>, vector<16x128xf32>, vector<1x128xf32> -> vector<1x128xf32>
    %c0_15 = arith.constant 0 : index
    %c0_16 = arith.constant 0 : index
    %18 = vector.load %arg7[%c0_15, %c0_16] : memref<1x1xf32, #tpu.memory_space<vmem>>, vector<1x1xf32>
    %19 = vector.broadcast %18 : vector<1x1xf32> to vector<1x128xf32>
    %20 = arith.addf %17, %19 : vector<1x128xf32>
    %c0_17 = arith.constant 0 : index
    %c0_18 = arith.constant 0 : index
    %21 = vector.load %arg8[%c0_17, %c0_18] : memref<1x128xf32, #tpu.memory_space<vmem>>, vector<1x128xf32>
    tpu.vector_store %arg8[%c0_17, %c0_18], %20 {strides = array<i32>} : memref<1x128xf32, #tpu.memory_space<vmem>>, vector<1x128xf32>,
    return
  }
  func.func @transform_0(%arg0: i32) -> (i32, i32) {
    %c0_i32 = arith.constant 0 : i32
    %c0_i32_0 = arith.constant 0 : i32
    return %arg0, %c0_i32 : i32, i32
  }
  func.func @transform_1(%arg0: i32) -> (i32, i32) {
    %c0_i32 = arith.constant 0 : i32
    %c0_i32_0 = arith.constant 0 : i32
    %c0_i32_1 = arith.constant 0 : i32
    return %c0_i32, %c0_i32_0 : i32, i32
  }
  func.func @transform_2(%arg0: i32) -> (i32, i32) {
    %c0_i32 = arith.constant 0 : i32
    %c0_i32_0 = arith.constant 0 : i32
    %c0_i32_1 = arith.constant 0 : i32
    return %c0_i32, %c0_i32_0 : i32, i32
  }
  func.func @transform_3(%arg0: i32) -> (i32, i32) {
    %c0_i32 = arith.constant 0 : i32
    %c0_i32_0 = arith.constant 0 : i32
    %c0_i32_1 = arith.constant 0 : i32
    return %c0_i32, %c0_i32_0 : i32, i32
  }
  func.func @transform_4(%arg0: i32) -> (i32, i32) {
    %c0_i32 = arith.constant 0 : i32
    %c0_i32_0 = arith.constant 0 : i32
    %c0_i32_1 = arith.constant 0 : i32
    return %c0_i32, %c0_i32_0 : i32, i32
  }
  func.func @transform_5(%arg0: i32) -> (i32, i32) {
    %c0_i32 = arith.constant 0 : i32
    %c0_i32_0 = arith.constant 0 : i32
    %c0_i32_1 = arith.constant 0 : i32
    return %c0_i32, %c0_i32_0 : i32, i32
  }
  func.func @transform_6(%arg0: i32) -> (i32, i32) {
    %c0_i32 = arith.constant 0 : i32
    %c0_i32_0 = arith.constant 0 : i32
    %c0_i32_1 = arith.constant 0 : i32
    return %c0_i32, %c0_i32_0 : i32, i32
  }
  func.func @transform_7(%arg0: i32) -> (i32, i32) {
    %c0_i32 = arith.constant 0 : i32
    %c0_i32_0 = arith.constant 0 : i32
    return %c0_i32, %arg0 : i32, i32
  }
}

</mosaic_0001>

<bundles_post_ra>
// kernel: tpu_custom_call.1
= control target key start
LH: loop header
LB: loop body
LE: loop exit
PB: predicated region body
PF: predicated region fallthrough
CT: control target
= control target key end

     0   :  { %s810_s0 = inlined_call_operand.vmem [shape: f32[8,30], index: 0, kind: input, shape index: {}]   ;;  %s811_s1 = inlined_call_operand.vmem [shape: f32[32,30], index: 1, kind: input, shape index: {}]   ;;  %s812_s2 = inlined_call_operand.vmem [shape: f32[32,1], index: 2, kind: input, shape index: {}]   ;;  %s813_s3 = inlined_call_operand.vmem [shape: f32[16,32], index: 3, kind: input, shape index: {}]   ;;  %s814_s4 = inlined_call_operand.vmem [shape: f32[16,1], index: 4, kind: input, shape index: {}]   ;;  %s815_s5 = inlined_call_operand.vmem [shape: f32[1,16], index: 5, kind: input, shape index: {}]   ;;  %s816_s6 = inlined_call_operand.<no memory space> [shape: f32[1,1], index: 6, kind: input, shape index: {}]   ;;  %s817_s7 = inlined_call_operand.hbm [shape: f32[1,128], index: 7, kind: output, shape index: {}]  }
   0x1   :  { %v12_v0 = vstv %s816_s6 }
   0x2   :  { %13 = vst [vmem:[#allocation2] sm:$0x1] %v12_v0 }
   0x3   :  { %v29_v1 = vld [vmem:[%s810_s0] sm:$0xff]  ;;  %v30_v2 = vld [vmem:[%s810_s0 + $0x8] sm:$0xff]  ;;  %vm73_vm0 = vcmask 244736   ;;  %v31_v3 = vld [vmem:[%s810_s0 + $0x10] sm:$0xff]  ;;  %v619_v7 = vmov 0  }
   0x4   :  { %v529_v4 = vpack.c.bf16 %v30_v2, %v29_v1  ;;  %vm678_vm1 = vmpackc.low %vm73_vm0, %vm73_vm0  ;;  %v32_v6 = vld [vmem:[%s810_s0 + $0x18] sm:$0xff]  ;;  %593 = vset.pattern.permute.xlu0 %v619_v7  ;;  %594 = vset.pattern.permute.xlu1 %v619_v7  ;;  %v45_v9 = vld [vmem:[%s811_s1] sm:$0xff] }
   0x5   :  { %v535_v8 = vpack.c.bf16 %v32_v6, %v31_v3  ;;  %v33_v10 = vld [vmem:[%s810_s0 + $0x20] sm:$0xff]  ;;  %v34_v11 = vld [vmem:[%s810_s0 + $0x28] sm:$0xff]  ;;  %505 = vmatprep.mubr.msk.f32.mxu0 %vm73_vm0, %v45_v9  ;;  %v51_v13 = vld [vmem:[%s812_s2 + $0x10] sm:$0xff] }
   0x6   :  { %531 = vmatprep.subr.msk.bf16.mxu0 %vm678_vm1, %v529_v4  ;;  %v49_v12 = vld [vmem:[%s812_s2] sm:$0xff]  ;;  %65 = vperm.xlu1 %594, %v51_v13   ;;  %v541_v14 = vpack.c.bf16 %v34_v11, %v33_v10  ;;  %v50_v15 = vld [vmem:[%s812_s2 + $0x8] sm:$0xff] }
   0x7   :  { %534 = vmatpush3.bf16.xpose.msk.msra.mxu0 %vm678_vm1, %v529_v4  ;;  %55 = vperm.xlu0 %593, %v49_v12  }
   0x8   :  { %537 = vmatprep.subr.msk.bf16.mxu0 %vm678_vm1, %v535_v8 }
   0x9   :  { %14 = vsyncpa [#allocation4], 0  ;;  %v52_v16 = vld [vmem:[%s812_s2 + $0x18] sm:$0xff]  ;;  %v225_v17 = vld [vmem:[%s814_s4] sm:$0xff]  ;;  %vm237_vm2 = vcmask 261120   ;;  %v620_v58 = vmov 0.0|0.0   ;;  %v328_v6 = vlaneseq }
   0xa   :  { %70 = vperm.xlu1 %594, %v52_v16   ;;  %v35_v18 = vld [vmem:[%s810_s0 + $0x30] sm:$0xff]  ;;  %v36_v19 = vld [vmem:[%s810_s0 + $0x38] sm:$0xff]  ;;  %v226_v20 = vld [vmem:[%s814_s4 + $0x8] sm:$0xff]  ;;  %vm621_vm3 = vmmov 0   ;;  %v622_v59 = vmov 0.0   ;;  %vm332_vm4 = vcmask 130048  }
   0xb   :  { %60 = vperm.xlu0 %593, %v50_v15   ;;  %v547_v21 = vpack.c.bf16 %v36_v19, %v35_v18  ;;  %v322_v22 = vld [vmem:[#allocation2] sm:$0x1]  ;;  %v38_v24 = vld [vmem:[%s810_s0 + $0x48] sm:$0xff]  ;;  %v39_v26 = vld [vmem:[%s810_s0 + $0x50] sm:$0xff]  ;;  %v329_v7 = vshrl.u32 %v328_v6, 7 }
   0xc   :  { %v37_v23 = vld [vmem:[%s810_s0 + $0x40] sm:$0xff]  ;;  %v40_v27 = vld [vmem:[%s810_s0 + $0x58] sm:$0xff]  ;;  %v42_v30 = vld [vmem:[%s810_s0 + $0x68] sm:$0xff] }
   0xd   :  { %v553_v25 = vpack.c.bf16 %v38_v24, %v37_v23  ;;  %v559_v28 = vpack.c.bf16 %v40_v27, %v39_v26  ;;  %v41_v29 = vld [vmem:[%s810_s0 + $0x60] sm:$0xff]  ;;  %v43_v32 = vld [vmem:[%s810_s0 + $0x70] sm:$0xff]  ;;  %v44_v33 = vld [vmem:[%s810_s0 + $0x78] sm:$0xff] }
   0xe   :  { %234 = vperm.xlu1 %594, %v226_v20   ;;  %v565_v31 = vpack.c.bf16 %v42_v30, %v41_v29  ;;  %v571_v34 = vpack.c.bf16 %v44_v33, %v43_v32  ;;  %v46_v35 = vld [vmem:[%s811_s1 + $0x8] sm:$0xff]  ;;  %v47_v36 = vld [vmem:[%s811_s1 + $0x10] sm:$0xff]  ;;  %v48_v37 = vld [vmem:[%s811_s1 + $0x18] sm:$0xff] }
   0xf   :  { %540 = vmatpush3.bf16.xpose.msk.msra.mxu0 %vm678_vm1, %v535_v8  ;;  %229 = vperm.xlu0 %593, %v225_v17   ;;  %v223_v38 = vld [vmem:[%s813_s3] sm:$0xff]  ;;  %v224_v57 = vld [vmem:[%s813_s3 + $0x8] sm:$0xff]  ;;  %v330_v8 = vsub.s32 0, %v329_v7  ;;  %s623_s3 = smov [#allocation3]  }
  0x10   :  { %543 = vmatprep.subr.msk.bf16.mxu0 %vm678_vm1, %v541_v14  ;;  %519 = vmatprep.mubr.msk.f32.mxu1 %vm237_vm2, %v223_v38  ;;  %v321_v5 = vld [vmem:[%s815_s5] sm:$0x1]  ;;  %s413_s8 = sshll.u32 %s623_s3, 4  ;;  %s414_s8 = int_to_ptr.vmem [resolvable:$true] %s413_s8 }
  0x11   :  { %s595_s6 = scalar_lea.vmem %s414_s8, 16  ;;  %s599_s9 = scalar_lea.vmem %s414_s8, 32 }
  0x12   :  { %p596_p0 = scmp.ne.s32.totalorder %s414_s8, %s595_s6  ;;  %p600_p1 = scmp.lt.s32.totalorder %s414_s8, %s414_s8 }
  0x13   :  { %325 = vperm.xlu0 %593, %v322_v22   ;;  %p601_p2 = scmp.lt.s32.totalorder %s599_s9, %s595_s6 }
  0x15   :  { %p602_p3 = por %p601_p2, %p600_p1 }
  0x17   :  { %546 = vmatpush3.bf16.xpose.msk.msra.mxu0 %vm678_vm1, %v541_v14  ;;  %p603_p4 = pnand %p602_p3, %p596_p0 }
  0x18   :  { %549 = vmatprep.subr.msk.bf16.mxu0 %vm678_vm1, %v547_v21 }
  0x1f   :  { %552 = vmatpush3.bf16.xpose.msk.msra.mxu0 %vm678_vm1, %v547_v21 }
  0x20   :  { %555 = vmatprep.subr.msk.bf16.mxu0 %vm678_vm1, %v553_v25 }
  0x27   :  { %558 = vmatpush3.bf16.xpose.msk.msra.mxu0 %vm678_vm1, %v553_v25 }
  0x28   :  { %561 = vmatprep.subr.msk.bf16.mxu0 %vm678_vm1, %v559_v28 }
  0x2f   :  { %564 = vmatpush3.bf16.xpose.msk.msra.mxu0 %vm678_vm1, %v559_v28 }
  0x30   :  { %567 = vmatprep.subr.msk.bf16.mxu0 %vm678_vm1, %v565_v31 }
  0x37   :  { %570 = vmatpush3.bf16.xpose.msk.msra.mxu0 %vm678_vm1, %v565_v31 }
  0x38   :  { %573 = vmatprep.subr.msk.bf16.mxu0 %vm678_vm1, %v571_v34 }
  0x3f   :  { %576 = vmatpush3.bf16.xpose.msk.msra.mxu0 %vm678_vm1, %v571_v34 }
  0x46   :  { %506 = vmatmul.mubr.msk.f32.vlgmr.msra.gmra.mrb[0].mxu0 %vm73_vm0, %v46_v35 }
  0x47   :  { %508 = vmatprep.mubr.msk.f32.mxu0 %vm73_vm0, %v47_v36 }
  0x4a   :  { %509 = vmatmul.mubr.msk.f32.gmra.mrb[2].mxu0 %vm73_vm0, %v48_v37 }
  0x85   :  { %v66_v40 = vpop.permute.xlu1 %65 }
  0x86   :  { %v56_v39 = vpop.permute.xlu0 %55 }
  0x89   :  { %v71_v47 = vpop.permute.xlu1 %70 }
  0x8a   :  { %v61_v41 = vpop.permute.xlu0 %60 }
  0x8d   :  { %v235_v60 = vpop.permute.xlu1 %234 }
  0x8e   :  { %v230_v62 = vpop.permute.xlu0 %229 }
  0x92   :  { %v326_v9 = vpop.permute.xlu0 %325 }
  0x93   :  { %v331_v10 = vrot.slane %v326_v9, %v330_v8 }
 0x119   :  { %v507_v42 = vpop.f32.mrb[0].mxu0 }
 0x11a   :  { %v206_v43 = vadd.f32 %v507_v42, %v61_v41  ;;  %v200_v44 = vpop.f32.mrb[1].mxu0 }
 0x11b   :  { %v201_v45 = vadd.f32 %v200_v44, %v56_v39 }
 0x11c   :  { %v220_v46 = vmax.f32 %v206_v43, 0.0 }
 0x11d   :  { %v219_v48 = vmax.f32 %v201_v45, 0.0  ;;  %v510_v49 = vpop.f32.mrb[2].mxu0 }
 0x11e   :  { %v216_v50 = vadd.f32 %v510_v49, %v71_v47  ;;  %v210_v51 = vpop.f32.mrb[3].mxu0 }
 0x11f   :  { %v211_v52 = vadd.f32 %v210_v51, %v66_v40  ;;  %v577_v53 = vpack.c.bf16 %v220_v46, %v219_v48 }
 0x120   :  { %v222_v54 = vmax.f32 %v216_v50, 0.0 }
 0x121   :  { %v221_v55 = vmax.f32 %v211_v52, 0.0  ;;  %578 = vmatprep.subr.bf16.mxu1 %v577_v53 }
 0x122   :  { %580 = vmatpush3.bf16.msra.mxu1 %v577_v53 }
 0x123   :  { %v581_v56 = vpack.c.bf16 %v222_v54, %v221_v55 }
 0x125   :  { %582 = vmatprep.subr.bf16.mxu1 %v581_v56 }
 0x126   :  { %584 = vmatpush3.bf16.msra.mxu1 %v581_v56 }
 0x127   :  { %585 = vmatprep.subr.bf16.mxu1 %v620_v58 }
 0x129   :  { %520 = vmatmul.mubr.msk.f32.vlgmr.msra.gmra.mrb[0].mxu1 %vm237_vm2, %v224_v57 }
 0x12a   :  { %526 = vmatprep.mubr.msk.f32.mxu1 %vm621_vm3, %v622_v59 }
 0x1fc   :  { %v521_v61 = vpop.f32.mrb[0].mxu1 }
 0x1fd   :  { %v316_v63 = vadd.f32 %v521_v61, %v235_v60  ;;  %v310_v0 = vpop.f32.mrb[1].mxu1 }
 0x1fe   :  { %v311_v1 = vadd.f32 %v310_v0, %v230_v62 }
 0x1ff   :  { %v320_v2 = vmax.f32 %v316_v63, 0.0 }
 0x200   :  { %v319_v3 = vmax.f32 %v311_v1, 0.0 }
 0x202   :  { %v586_v4 = vpack.c.bf16 %v320_v2, %v319_v3 }
 0x204   :  { %587 = vmatpush3.bf16.msra.mxu1 %v586_v4 }
 0x207   :  { %527 = vmatmul.mubr.msk.f32.vlgmr.msra.gmra.mrb[2].mxu1 %vm332_vm4, %v321_v5 }
 0x2da   :  { %v402_v11 = vpop.f32.mrb[2].mxu1 }
 0x2db   :  { %v403_v12 = vadd.f32 %v402_v11, %v331_v10  ;;  %v528_v13 = vpop.f32.mrb[3].mxu1 }
 0x2dd   :  { %406 = vst [vmem:[#allocation3] sm:$0x1] %v403_v12 }
 0x2de   :  { %606 = shalt.err (!%p603_p4)
}
 0x2df   :  { %s607_s4 = scalar_lea.hbm %s817_s7, 16 }
 0x2e0   :  { %p608_p5 = scmp.ne.s32.totalorder %s817_s7, %s607_s4  ;;  %p611_p6 = scmp.lt.u32.totalorder %s607_s4, %s817_s7 }
 0x2e2   :  { %p613_p7 = pnand %p611_p6, %p608_p5 }
 0x2e4   :  { %616 = shalt.err (!%p613_p7)
}
 0x2e5   :  { %416 = dma.vmem_to_hbm [thread:$0]  %s414_s8, 16, %s817_s7, [#allocation4]  }
 0x2e6   :  { %617 = dma.done.wait [#allocation4], 16  }
 0x2e7   :  { %618 = vsyncadd [#allocation4], 4294967280 }
 0x2e8   :  { %420 = vsyncpa [#allocation4], 1 }

</bundles_post_ra>
